<compile_context>
chip_gen: v5e
topology: v5e:2x2
jax: 0.10.0
libtpu: 0.0.40
codegen_flags: <defaults>
</compile_context>

<pallas_src>
import jax
import jax.numpy as jnp
from jax.experimental import pallas as pl
from jax.experimental.pallas import tpu as pltpu

F32 = jnp.float32


def _round_up(x, m):
    return ((x + m - 1) // m) * m


# --------------------------------------------------------------------------
# Fused kernel body (one grid step = TB batch rows):
#   h      = relu(scores_tile @ W1 + b1)            # MXU + VPU
#   logits = sum(h * w2_row, axis=-1) + b2          # VPU mul + XLU lane-reduce
#   out    = sigmoid(logits)                        # EUP
# Padded hidden lanes (>= bn) carry zero weights/bias, so they contribute
# exactly zero to the reduce — the result is exact for the real rows.
# --------------------------------------------------------------------------
def _fusion_classifier_kernel(s_ref, w1_ref, b1_ref, w2r_ref, b2_ref, o_ref):
    s = s_ref[...]                                                   # (TB, din)
    h = jnp.dot(s, w1_ref[...], preferred_element_type=F32) + b1_ref[...]
    h = jnp.maximum(h, 0.0)                                          # ReLU
    logits = jnp.sum(h * w2r_ref[...], axis=-1, keepdims=True) + b2_ref[...]
    o_ref[...] = jax.nn.sigmoid(logits)                              # (TB, 1)


# --------------------------------------------------------------------------
# Forward wrapper: one pallas_call, 1-D batch grid, resident weights.
# --------------------------------------------------------------------------
def egsc_fusion_classifier_forward(params, scores, *, tb_max=1024):
    """scores: (B, 2*bottle_neck_neurons) -> (B,) similarity scores."""
    B, din = scores.shape
    w1_p, b1_p, w2r_p, b2_p = (params["w1"], params["b1"],
                               params["w2_row"], params["b2"])
    assert w1_p.shape[0] == din, (w1_p.shape, din)
    bn_pad = w1_p.shape[1]

    scores = scores.astype(F32)

    # Batch tile: multiple of 8 sublanes; capped so VMEM stays tiny even
    # double-buffered on v7x (64 MiB physical).  Edge blocks are handled by
    # Pallas (out-of-bounds reads are garbage rows, out-of-bounds output rows
    # are masked on writeback — rows are independent, so this is exact).
    tb = min(tb_max, _round_up(B, 8))
    grid = (pl.cdiv(B, tb),)

    out = pl.pallas_call(
        _fusion_classifier_kernel,
        out_shape=jax.ShapeDtypeStruct((B, 1), F32),
        grid=grid,
        in_specs=[
            pl.BlockSpec((tb, din), lambda i: (i, 0)),        # streamed scores
            pl.BlockSpec((din, bn_pad), lambda i: (0, 0)),    # resident W1
            pl.BlockSpec((1, bn_pad), lambda i: (0, 0)),      # resident b1
            pl.BlockSpec((1, bn_pad), lambda i: (0, 0)),      # resident w2 row
            pl.BlockSpec((1, 1), lambda i: (0, 0)),           # resident b2
        ],
        out_specs=pl.BlockSpec((tb, 1), lambda i: (i, 0)),
        compiler_params=pltpu.CompilerParams(
            dimension_semantics=("parallel",)),               # v7x megacore
    )(scores, w1_p, b1_p, w2r_p, b2_p)

    return out.reshape(-1)   # torch .view(-1)


# --------------------------------------------------------------------------
# Parameter construction (PyTorch nn.Linear uniform init) + one-time padding
# to kernel-ready, lane-dense layouts.
# --------------------------------------------------------------------------
def _linear_params(key, din, dout):
    kw, kb = jax.random.split(key)
    bound = 1.0 / (din ** 0.5)
    w = jax.random.uniform(kw, (din, dout), F32, -bound, bound)
    b = jax.random.uniform(kb, (1, dout), F32, -bound, bound)
    return w, b


def fusion_classifier_params(key, bottle_neck_neurons):
    bn = bottle_neck_neurons
    din = 2 * bn
    bn_pad = max(_round_up(bn, 128), 128)   # lane-dense hidden dim

    k1, k2 = jax.random.split(key)
    w1, b1 = _linear_params(k1, din, bn)    # feat_layer
    w2, b2 = _linear_params(k2, bn, 1)      # scoring_layer

    # Pad ONCE here (hoisted out of the forward path).  Zero padding is
    # exact: padded hidden columns have zero weights and zero bias.
    w1_p = jnp.zeros((din, bn_pad), F32).at[:, :bn].set(w1)
    b1_p = jnp.zeros((1, bn_pad), F32).at[:, :bn].set(b1)
    w2_row = jnp.zeros((1, bn_pad), F32).at[:, :bn].set(w2.T)   # (1, bn_pad)
    b2_p = b2.reshape(1, 1).astype(F32)

    return dict(w1=w1_p, b1=b1_p, w2_row=w2_row, b2=b2_p)


# --------------------------------------------------------------------------
# Pure-JAX reference for correctness checking.
# --------------------------------------------------------------------------
def _reference_forward(params, scores):
    h = jnp.maximum(scores.astype(F32) @ params["w1"] + params["b1"], 0.0)
    logits = jnp.sum(h * params["w2_row"], axis=-1) + params["b2"][0, 0]
    return jax.nn.sigmoid(logits)


if __name__ == "__main__":
    # args.bottle_neck_neurons = 16 (EGSC default); a batch of 2 graph pairs.
    bottle_neck_neurons = 16
    batch = 2

    key = jax.random.PRNGKey(0)
    k_in, k_par, k_big = jax.random.split(key, 3)

    params = fusion_classifier_params(k_par, bottle_neck_neurons)

    # Small case (B=2).
    scores = jax.random.normal(k_in, (batch, 2 * bottle_neck_neurons), F32)
    out = jax.block_until_ready(egsc_fusion_classifier_forward(params, scores))
    ref = _reference_forward(params, scores)

    assert out.shape == (batch,), out.shape
    assert jnp.all(jnp.isfinite(out))
    assert jnp.all((out >= 0.0) & (out <= 1.0))            # sigmoid range
    assert jnp.allclose(out, ref, rtol=1e-5, atol=1e-6)

    # Larger batch exercising multiple grid steps + a partial edge block.
    big_b = 300
    scores_big = jax.random.normal(k_big, (big_b, 2 * bottle_neck_neurons), F32)
    out_big = jax.block_until_ready(
        egsc_fusion_classifier_forward(params, scores_big, tb_max=128))
    ref_big = _reference_forward(params, scores_big)
    assert out_big.shape == (big_b,)
    assert jnp.allclose(out_big, ref_big, rtol=1e-5, atol=1e-6)

    print("KERNEL_OK")
</pallas_src>

<mosaic_0001>
module attributes {stable_mosaic.version = 11 : i64} {
  func.func @_fusion_classifier_kernel(%arg0: i32, %arg1: memref<8x32xf32, #tpu.memory_space<vmem>>, %arg2: memref<32x128xf32, #tpu.memory_space<vmem>>, %arg3: memref<1x128xf32, #tpu.memory_space<vmem>>, %arg4: memref<1x128xf32, #tpu.memory_space<vmem>>, %arg5: memref<1x1xf32, #tpu.memory_space<vmem>>, %arg6: memref<8x1xf32, #tpu.memory_space<vmem>>) attributes {dimension_semantics = [#tpu.dimension_semantics<parallel>], iteration_bounds = array<i64: 1>, scalar_prefetch = 0 : i64, scratch_operands = 0 : i64, tpu.core_type = #tpu.core_type<tc>, window_params = [{transform_indices = @transform_0, window_bounds = array<i64: 8, 32>}, {pipeline_mode = #tpu.pipeline_mode<synchronous>, transform_indices = @transform_1, window_bounds = array<i64: 32, 128>}, {pipeline_mode = #tpu.pipeline_mode<synchronous>, transform_indices = @transform_2, window_bounds = array<i64: 1, 128>}, {pipeline_mode = #tpu.pipeline_mode<synchronous>, transform_indices = @transform_3, window_bounds = array<i64: 1, 128>}, {pipeline_mode = #tpu.pipeline_mode<synchronous>, transform_indices = @transform_4, window_bounds = array<i64: 1, 1>}, {transform_indices = @transform_5, window_bounds = array<i64: 8, 1>}]} {
    %c0 = arith.constant 0 : index
    %c0_0 = arith.constant 0 : index
    %0 = vector.load %arg1[%c0, %c0_0] : memref<8x32xf32, #tpu.memory_space<vmem>>, vector<8x32xf32>
    %c0_1 = arith.constant 0 : index
    %c0_2 = arith.constant 0 : index
    %1 = vector.load %arg2[%c0_1, %c0_2] : memref<32x128xf32, #tpu.memory_space<vmem>>, vector<32x128xf32>
    %cst = arith.constant dense<0.000000e+00> : vector<8x128xf32>
    %2 = tpu.matmul %0, %1, %cst {dimension_numbers = #tpu.dot_dimension_numbers<[1], [0], [0], [1], [0, 0, 1, 1], [], []>} : vector<8x32xf32>, vector<32x128xf32>, vector<8x128xf32> -> vector<8x128xf32>
    %c0_3 = arith.constant 0 : index
    %c0_4 = arith.constant 0 : index
    %3 = vector.load %arg3[%c0_3, %c0_4] : memref<1x128xf32, #tpu.memory_space<vmem>>, vector<1x128xf32>
    %4 = vector.broadcast %3 : vector<1x128xf32> to vector<8x128xf32>
    %5 = arith.addf %2, %4 : vector<8x128xf32>
    %cst_5 = arith.constant 0.000000e+00 : f32
    %6 = vector.broadcast %cst_5 : f32 to vector<8x128xf32>
    %7 = arith.maximumf %5, %6 : vector<8x128xf32>
    %c0_6 = arith.constant 0 : index
    %c0_7 = arith.constant 0 : index
    %8 = vector.load %arg4[%c0_6, %c0_7] : memref<1x128xf32, #tpu.memory_space<vmem>>, vector<1x128xf32>
    %9 = vector.broadcast %8 : vector<1x128xf32> to vector<8x128xf32>
    %10 = arith.mulf %7, %9 : vector<8x128xf32>
    %cst_8 = arith.constant dense<0.000000e+00> : vector<8xf32>
    %11 = vector.multi_reduction <add>, %10, %cst_8 [1] : vector<8x128xf32> to vector<8xf32>
    %12 = vector.shape_cast %11 : vector<8xf32> to vector<8x1xf32>
    %c0_9 = arith.constant 0 : index
    %c0_10 = arith.constant 0 : index
    %13 = vector.load %arg5[%c0_9, %c0_10] : memref<1x1xf32, #tpu.memory_space<vmem>>, vector<1x1xf32>
    %14 = vector.broadcast %13 : vector<1x1xf32> to vector<8x1xf32>
    %15 = arith.addf %12, %14 : vector<8x1xf32>
    %16 = arith.negf %15 : vector<8x1xf32>
    %17 = math.exp %16 : vector<8x1xf32>
    %cst_11 = arith.constant 1.000000e+00 : f32
    %18 = vector.broadcast %cst_11 : f32 to vector<8x1xf32>
    %19 = arith.addf %18, %17 : vector<8x1xf32>
    %20 = arith.divf %18, %19 : vector<8x1xf32>
    %c0_12 = arith.constant 0 : index
    %c0_13 = arith.constant 0 : index
    %21 = vector.load %arg6[%c0_12, %c0_13] : memref<8x1xf32, #tpu.memory_space<vmem>>, vector<8x1xf32>
    tpu.vector_store %arg6[%c0_12, %c0_13], %20 {strides = array<i32>} : memref<8x1xf32, #tpu.memory_space<vmem>>, vector<8x1xf32>,
    return
  }
  func.func @transform_0(%arg0: i32) -> (i32, i32) {
    %c0_i32 = arith.constant 0 : i32
    %c0_i32_0 = arith.constant 0 : i32
    return %arg0, %c0_i32 : i32, i32
  }
  func.func @transform_1(%arg0: i32) -> (i32, i32) {
    %c0_i32 = arith.constant 0 : i32
    %c0_i32_0 = arith.constant 0 : i32
    %c0_i32_1 = arith.constant 0 : i32
    return %c0_i32, %c0_i32_0 : i32, i32
  }
  func.func @transform_2(%arg0: i32) -> (i32, i32) {
    %c0_i32 = arith.constant 0 : i32
    %c0_i32_0 = arith.constant 0 : i32
    %c0_i32_1 = arith.constant 0 : i32
    return %c0_i32, %c0_i32_0 : i32, i32
  }
  func.func @transform_3(%arg0: i32) -> (i32, i32) {
    %c0_i32 = arith.constant 0 : i32
    %c0_i32_0 = arith.constant 0 : i32
    %c0_i32_1 = arith.constant 0 : i32
    return %c0_i32, %c0_i32_0 : i32, i32
  }
  func.func @transform_4(%arg0: i32) -> (i32, i32) {
    %c0_i32 = arith.constant 0 : i32
    %c0_i32_0 = arith.constant 0 : i32
    %c0_i32_1 = arith.constant 0 : i32
    return %c0_i32, %c0_i32_0 : i32, i32
  }
  func.func @transform_5(%arg0: i32) -> (i32, i32) {
    %c0_i32 = arith.constant 0 : i32
    %c0_i32_0 = arith.constant 0 : i32
    return %arg0, %c0_i32 : i32, i32
  }
}

</mosaic_0001>

<bundles_post_ra>
// kernel: tpu_custom_call.1
= control target key start
LH: loop header
LB: loop body
LE: loop exit
PB: predicated region body
PF: predicated region fallthrough
CT: control target
= control target key end

     0   :  { %s236_s0 = inlined_call_operand.vmem [shape: f32[2,32], index: 0, kind: input, shape index: {}]   ;;  %s237_s1 = inlined_call_operand.hbm [shape: f32[32,128], index: 1, kind: input, shape index: {}]   ;;  %s238_s2 = inlined_call_operand.vmem [shape: f32[1,128], index: 2, kind: input, shape index: {}]   ;;  %s239_s3 = inlined_call_operand.vmem [shape: f32[1,128], index: 3, kind: input, shape index: {}]   ;;  %s240_s4 = inlined_call_operand.<no memory space> [shape: f32[1,1], index: 4, kind: input, shape index: {}]   ;;  %s241_s5 = inlined_call_operand.vmem [shape: f32[2,1], index: 5, kind: output, shape index: {}]  }
   0x1   :  { %v10_v0 = vstv %s240_s4 }
   0x2   :  { %11 = vst [vmem:[#allocation2] sm:$0x1] %v10_v0 }
   0x3   :  { %12 = vsyncpa [#allocation4], 0  ;;  %s19_s22 = sshll.u32 %s237_s1, 4  ;;  %s185_s23 = smov [#allocation3]   ;;  %s20_s22 = int_to_ptr.hbm [resolvable:$true] %s19_s22 }
   0x4   :  { %s21_s24 = sshll.u32 %s185_s23, 4  ;;  %s186_s25 = smov 128   ;;  %s22_s24 = int_to_ptr.vmem [resolvable:$true] %s21_s24 }
   0x5   :  { %s187_s26 = smov 8  }
   0x6   :  { %27 = dma.hbm_to_vmem [thread:$0]  %s20_s22, 512, %s22_s24, [#allocation4], %s186_s25, %s186_s25, %s187_s26  }
   0x7   :  { %183 = dma.done.wait [#allocation4], 512  }
   0x8   :  { %184 = vsyncadd [#allocation4], 4294966784  ;;  %v42_v1 = vld [vmem:[#allocation3 + $0x18] sm:$0xff]  ;;  %v41_v2 = vld [vmem:[#allocation3 + $0x10] sm:$0xff]  ;;  %vm47_vm0 = vcmask 261120   ;;  %vm103_vm4 = vcmask 7168  }
   0x9   :  { %63 = vmatpush.msra.mxu0 %v42_v1  ;;  %v40_v3 = vld [vmem:[#allocation3 + $0x8] sm:$0xff]  ;;  %v39_v4 = vld [vmem:[#allocation3] sm:$0xff]  ;;  %v152_v6 = vld [vmem:[%s238_s2] ss:$0 sm:$0xff] }
   0xa   :  { %v38_v5 = vld [vmem:[%s236_s0] sm:$0xff] }
   0xb   :  { %64 = vmatpush.msra.mxu0 %v41_v2  ;;  %v153_v9 = vld [vmem:[%s239_s3] ss:$0 sm:$0xff] }
   0xc   :  { %v154_v12 = vld [vmem:[#allocation2] ss:$0 sm:$0xff] }
   0xd   :  { %65 = vmatpush.msra.mxu0 %v40_v3 }
   0xf   :  { %66 = vmatpush.msra.mxu0 %v39_v4 }
  0x10   :  { %147 = vmatmul.msk.f32.vlgmr.msra.gmra.mxu0 %vm47_vm0, %v38_v5 }
  0x8d   :  { %v68_v7 = vpop.f32.mrf.mxu0 }
  0x8e   :  { %v69_v8 = vadd.f32 %v152_v6, %v68_v7 }
  0x90   :  { %v71_v10 = vmax.f32 %v69_v8, 0.0 }
  0x92   :  { %v76_v11 = vmul.f32 %v153_v9, %v71_v10 }
  0x94   :  { %77 = vadd.xlane.f32.xlu0 %v76_v11 }
 0x107   :  { %v78_v13 = vpop.xlane.xlu0 %77 }
 0x108   :  { %v83_v14 = vadd.f32 %v154_v12, %v78_v13 }
 0x10a   :  { %v148_v15 = vmul.f32 -1.442695, %v83_v14 }
 0x10c   :  { %155 = vpow2.f32 %v148_v15 }
 0x112   :  { %v156_v16 = vpop.eup %155 }
 0x113   :  { %v87_v17 = vadd.f32 1.0, %v156_v16 }
 0x115   :  { %157 = vrcp.f32 %v87_v17  ;;  %v99_v21 = vand.u32 2147483648, %v87_v17  ;;  %v97_v23 = vand.u32 2147483647, %v87_v17  ;;  %vm93_vm2 = vweird.f32 %v87_v17 }
 0x117   :  { %v100_v25 = vor.u32 1.1754944e-38, %v99_v21  ;;  %vm98_vm5 = vcmp.eq.f32.partialorder %v97_v23, 8.507059e+37 }
 0x11b   :  { %v158_v18 = vpop.eup %157 }
 0x11c   :  { %v89_v19 = vmul.f32 %v158_v18, %v87_v17  ;;  %vm94_vm1 = vweird.f32 %v158_v18 }
 0x11d   :  { %vm95_vm3 = vmor %vm93_vm2, %vm94_vm1 }
 0x11e   :  { %v90_v20 = vsub.f32 1.0, %v89_v19 }
 0x120   :  { %v91_v22 = vmul.f32 %v158_v18, %v90_v20 }
 0x122   :  { %v92_v24 = vadd.f32 %v158_v18, %v91_v22 }
 0x124   :  { %v96_v26 = vsel %vm95_vm3, %v158_v18, %v92_v24 }
 0x125   :  { %v101_v27 = vsel %vm98_vm5, %v100_v25, %v96_v26 }
 0x126   :  { %104 = vst.msk [vmem:[#allocation5] sm:$0xff] %vm103_vm4, %v101_v27 }
 0x12d   :  { %v123_v28 = vld [vmem:[#allocation5] sm:$0x3] }
 0x12e   :  { %124 = vst [vmem:[%s241_s5] sm:$0x3] %v123_v28 }
 0x12f   :  { %142 = vsyncpa [#allocation4], 1 }

</bundles_post_ra>
